<compile_context>
chip_gen: v5e
topology: v5e:2x2
jax: 0.10.0
libtpu: 0.0.40
codegen_flags: <defaults>
</compile_context>

<pallas_src>
import jax
import jax.numpy as jnp
from jax.experimental import pallas as pl
from jax.experimental.pallas import tpu as pltpu

MAX_LENGTH = 512   # tokenizer(..., truncation=True, max_length=512, padding='max_length')
PAD_ID = 0         # T5 pad token id
EOS_ID = 1         # T5 </s> token id (appended by the tokenizer)

# Row-tile sizing (rows of tokens/ids/mask per grid step).
_ROW_TILE_MAX = 512    # keeps double-buffered VMEM ~5 MiB: safe on v5e/v6e/v7x defaults
_ROW_TILE_MIN = 256    # below this, per-step overhead (~0.35 us) stops amortizing
_TARGET_STEPS = 4      # aim for >= 4 grid steps so read/compute/writeback overlap

# TODO(synk): the actual string tokenization (SentencePiece vocabulary lookup)
# has no Pallas equivalent; token ids are synthesized in plain JAX below.


def _choose_row_tile(B):
    """Rows per grid step: multiple of 8, >= _TARGET_STEPS steps when possible."""
    if B <= _ROW_TILE_MIN or (B % 8) != 0:
        # Tiny or ragged batches: one full-array block (block == full dim is legal).
        return B
    tb = 8 * pl.cdiv(pl.cdiv(B, 8), _TARGET_STEPS)
    tb = max(_ROW_TILE_MIN, min(_ROW_TILE_MAX, tb))
    return min(tb, B)


def _tok_pack_kernel(tokens_ref, lengths_ref, ids_ref, mask_ref):
    """Pad one batch tile of token buffers with PAD_ID and build the mask.

    tokens_ref : (TB, L) int32 raw token ids (garbage past each row's length)
    lengths_ref: (TB, 1) int32 valid token count per row (already clamped to L)
    ids_ref    : (TB, L) int32 output padded input_ids
    mask_ref   : (TB, L) int8  output attention_mask
    """
    toks = tokens_ref[...]
    lens = lengths_ref[...]                                    # clamp hoisted to wrapper
    col = jax.lax.broadcasted_iota(jnp.int32, toks.shape, 1)   # lane index
    valid = col < lens                                         # (TB, L) bool
    ids_ref[...] = jnp.where(valid, toks, jnp.int32(PAD_ID))
    mask_ref[...] = valid.astype(mask_ref.dtype)


def extract_features(tokens, lengths, *, mask_dtype=jnp.int8, donate_tokens=False):
    """Pallas-backed equivalent of Extract_feautres.forward (post-tokenization).

    tokens        : (B, MAX_LENGTH) integer raw token-id buffer per sentence pair
    lengths       : (B,) integer true token counts (pre-truncation); rows longer
                    than 512 lose their trailing EOS, matching HF truncation.
    mask_dtype    : dtype of the attention mask output (int8 default; PyTorch
                    reference stacks int64 — widen in the consumer if needed).
    donate_tokens : set True ONLY if the caller no longer needs `tokens`; the
                    ids output is then written in place over the token buffer.
    returns       : (ids int32, masks mask_dtype), each (B, MAX_LENGTH)
    """
    B, L = tokens.shape
    assert L == MAX_LENGTH
    assert jnp.issubdtype(tokens.dtype, jnp.integer)
    # Normalize dtype at the boundary: avoids doubled read traffic for int64
    # inputs and keeps the optional {0:0} alias valid.
    tokens = tokens.astype(jnp.int32)
    lengths = jnp.minimum(lengths.astype(jnp.int32),
                          jnp.int32(MAX_LENGTH)).reshape(B, 1)   # truncation=True

    tb = _choose_row_tile(B)
    grid = (pl.cdiv(B, tb),)

    # Alias tokens -> ids only when the caller donated the buffer; otherwise
    # XLA would insert a defensive copy and negate the HBM saving.
    io_aliases = {0: 0} if donate_tokens else {}

    mask_bytes = jnp.dtype(mask_dtype).itemsize
    cost = pl.CostEstimate(
        flops=0,
        transcendentals=0,
        bytes_accessed=int(B * L * (4 + 4 + mask_bytes) + B * 4),
    )

    ids, masks = pl.pallas_call(
        _tok_pack_kernel,
        out_shape=(
            jax.ShapeDtypeStruct((B, L), jnp.int32),
            jax.ShapeDtypeStruct((B, L), mask_dtype),
        ),
        grid=grid,
        in_specs=[
            pl.BlockSpec((tb, L), lambda i: (i, 0)),
            pl.BlockSpec((tb, 1), lambda i: (i, 0)),
        ],
        out_specs=(
            pl.BlockSpec((tb, L), lambda i: (i, 0)),
            pl.BlockSpec((tb, L), lambda i: (i, 0)),
        ),
        input_output_aliases=io_aliases,
        compiler_params=pltpu.CompilerParams(
            dimension_semantics=("parallel",)),
        cost_estimate=cost,
    )(tokens, lengths)
    return ids, masks


def _synthetic_tokenized_sentences(key, batch, vocab_size=32100):
    """Stand-in for T5Tokenizer: random token ids + lengths, EOS at the end."""
    k_tok, k_len = jax.random.split(key)
    # random "sentence pair" lengths between 3 and 40 tokens (incl. trailing EOS)
    lengths = jax.random.randint(k_len, (batch,), minval=3, maxval=41,
                                 dtype=jnp.int32)
    tokens = jax.random.randint(k_tok, (batch, MAX_LENGTH), minval=2,
                                maxval=vocab_size, dtype=jnp.int32)
    # place EOS token at the last valid position of each row
    col = jnp.arange(MAX_LENGTH, dtype=jnp.int32)[None, :]
    tokens = jnp.where(col == (lengths[:, None] - 1), jnp.int32(EOS_ID), tokens)
    return tokens, lengths


if __name__ == "__main__":
    key = jax.random.PRNGKey(0)
    batch = 32  # small demo batch of "sentence pairs"

    tokens, lengths = _synthetic_tokenized_sentences(key, batch)

    # reference semantics (pure JAX)
    col = jnp.arange(MAX_LENGTH, dtype=jnp.int32)[None, :]
    valid = col < jnp.minimum(lengths, MAX_LENGTH)[:, None]
    ref_ids = jnp.where(valid, tokens, PAD_ID).astype(jnp.int32)
    ref_masks = valid.astype(jnp.int8)

    ids, masks = extract_features(tokens, lengths)
    jax.block_until_ready((ids, masks))

    assert ids.shape == (batch, MAX_LENGTH) and ids.dtype == jnp.int32
    assert masks.shape == (batch, MAX_LENGTH) and masks.dtype == jnp.int8
    assert bool(jnp.all(ids == ref_ids)) and bool(jnp.all(masks == ref_masks))

    print("KERNEL_OK")
</pallas_src>

<mosaic_0001>
module attributes {stable_mosaic.version = 11 : i64} {
  func.func @_tok_pack_kernel(%arg0: i32, %arg1: memref<32x512xi32, #tpu.memory_space<vmem>>, %arg2: memref<32x1xi32, #tpu.memory_space<vmem>>, %arg3: memref<32x512xi32, #tpu.memory_space<vmem>>, %arg4: memref<32x512xi8, #tpu.memory_space<vmem>>) attributes {dimension_semantics = [#tpu.dimension_semantics<parallel>], iteration_bounds = array<i64: 1>, scalar_prefetch = 0 : i64, scratch_operands = 0 : i64, tpu.core_type = #tpu.core_type<tc>, window_params = [{transform_indices = @transform_0, window_bounds = array<i64: 32, 512>}, {transform_indices = @transform_1, window_bounds = array<i64: 32, 1>}, {transform_indices = @transform_2, window_bounds = array<i64: 32, 512>}, {transform_indices = @transform_3, window_bounds = array<i64: 32, 512>}]} {
    %c0 = arith.constant 0 : index
    %c0_0 = arith.constant 0 : index
    %0 = vector.load %arg1[%c0, %c0_0] : memref<32x512xi32, #tpu.memory_space<vmem>>, vector<32x512xi32>
    %c0_1 = arith.constant 0 : index
    %c0_2 = arith.constant 0 : index
    %1 = vector.load %arg2[%c0_1, %c0_2] : memref<32x1xi32, #tpu.memory_space<vmem>>, vector<32x1xi32>
    %2 = tpu.iota {dimensions = array<i32: 1>} : vector<32x512xi32>
    %3 = vector.broadcast %1 : vector<32x1xi32> to vector<32x512xi32>
    %4 = arith.cmpi slt, %2, %3 : vector<32x512xi32>
    %c0_i32 = arith.constant 0 : i32
    %5 = vector.broadcast %c0_i32 : i32 to vector<32x512xi32>
    %6 = arith.select %4, %0, %5 : vector<32x512xi1>, vector<32x512xi32>
    %c0_3 = arith.constant 0 : index
    %c0_4 = arith.constant 0 : index
    %7 = vector.load %arg3[%c0_3, %c0_4] : memref<32x512xi32, #tpu.memory_space<vmem>>, vector<32x512xi32>
    tpu.vector_store %arg3[%c0_3, %c0_4], %6 {strides = array<i32>} : memref<32x512xi32, #tpu.memory_space<vmem>>, vector<32x512xi32>,
    %8 = arith.extui %4 : vector<32x512xi1> to vector<32x512xi8>
    %c0_5 = arith.constant 0 : index
    %c0_6 = arith.constant 0 : index
    %9 = vector.load %arg4[%c0_5, %c0_6] : memref<32x512xi8, #tpu.memory_space<vmem>>, vector<32x512xi8>
    tpu.vector_store %arg4[%c0_5, %c0_6], %8 {strides = array<i32>} : memref<32x512xi8, #tpu.memory_space<vmem>>, vector<32x512xi8>,
    return
  }
  func.func @transform_0(%arg0: i32) -> (i32, i32) {
    %c0_i32 = arith.constant 0 : i32
    %c0_i32_0 = arith.constant 0 : i32
    return %arg0, %c0_i32 : i32, i32
  }
  func.func @transform_1(%arg0: i32) -> (i32, i32) {
    %c0_i32 = arith.constant 0 : i32
    %c0_i32_0 = arith.constant 0 : i32
    return %arg0, %c0_i32 : i32, i32
  }
  func.func @transform_2(%arg0: i32) -> (i32, i32) {
    %c0_i32 = arith.constant 0 : i32
    %c0_i32_0 = arith.constant 0 : i32
    return %arg0, %c0_i32 : i32, i32
  }
  func.func @transform_3(%arg0: i32) -> (i32, i32) {
    %c0_i32 = arith.constant 0 : i32
    %c0_i32_0 = arith.constant 0 : i32
    return %arg0, %c0_i32 : i32, i32
  }
}

</mosaic_0001>

<bundles_post_ra>
// kernel: tpu_custom_call.1
= control target key start
LH: loop header
LB: loop body
LE: loop exit
PB: predicated region body
PF: predicated region fallthrough
CT: control target
= control target key end

     0   :  { %9 = vsyncpa [#allocation3], 0  ;;  %s456_s0 = inlined_call_operand.hbm [shape: s32[32,512], index: 0, kind: input, shape index: {}]   ;;  %s457_s1 = inlined_call_operand.vmem [shape: s32[32,1], index: 1, kind: input, shape index: {}]   ;;  %s458_s2 = inlined_call_operand.hbm [shape: s32[32,512], index: 2, kind: output, shape index: {0}]   ;;  %s459_s3 = inlined_call_operand.hbm [shape: s8[32,512], index: 3, kind: output, shape index: {1}]  }
   0x1   :  { %10 = vsyncpa [#allocation4], 0 }
   0x2   :  { %11 = vsyncpa [#allocation7], 0  ;;  %s16_s14 = sshll.u32 %s456_s0, 4  ;;  %s271_s15 = smov [#allocation2]   ;;  %s17_s14 = int_to_ptr.hbm [resolvable:$true] %s16_s14 }
   0x3   :  { %s18_s16 = sshll.u32 %s271_s15, 4  ;;  %s272_s17 = smov 512   ;;  %s19_s16 = int_to_ptr.vmem [resolvable:$true] %s18_s16 }
   0x4   :  { %s273_s18 = smov 32  }
   0x5   :  { %24 = dma.hbm_to_vmem [thread:$0]  %s17_s14, 2048, %s19_s16, [#allocation3], %s272_s17, %s272_s17, %s273_s18  }
   0x6   :  { %265 = dma.done.wait [#allocation3], 2048  }
   0x7   :  { %266 = vsyncadd [#allocation3], 4294965248  ;;  %v274_v0 = vmov 0   ;;  %v51_v1 = vld [vmem:[%s457_s1 + $0x10] sm:$0xff]  ;;  %v49_v2 = vld [vmem:[%s457_s1] sm:$0xff]  ;;  %v53_v5 = vlaneseq  ;;  %s156_s29 = sshll.u32 %s458_s2, 4  ;;  %s157_s29 = int_to_ptr.hbm [resolvable:$true] %s156_s29 }
   0x8   :  { %192 = vset.pattern.permute.xlu1 %v274_v0  ;;  %191 = vset.pattern.permute.xlu0 %v274_v0  ;;  %v52_v3 = vld [vmem:[%s457_s1 + $0x18] sm:$0xff]  ;;  %v50_v4 = vld [vmem:[%s457_s1 + $0x8] sm:$0xff]  ;;  %v41_v10 = vld [vmem:[#allocation2 + $0x40] sm:$0xff]  ;;  %s275_s1 = smov [#allocation5]   ;;  %s276_s2 = smov [#allocation6]  }
   0x9   :  { %65 = vperm.xlu1 %192, %v51_v1   ;;  %59 = vperm.xlu0 %191, %v49_v2   ;;  %v317_v6 = vand.u32 127, %v53_v5  ;;  %v42_v11 = vld [vmem:[#allocation2 + $0x48] sm:$0xff]  ;;  %v43_v12 = vld [vmem:[#allocation2 + $0x50] sm:$0xff]  ;;  %v44_v15 = vld [vmem:[#allocation2 + $0x58] sm:$0xff]  ;;  %s405_s26 = sshll.u32 %s275_s1, 4  ;;  %s168_s30 = sshll.u32 %s276_s2, 4  ;;  %s155_s26 = int_to_ptr.vmem [resolvable:$true] %s405_s26  ;;  %s169_s30 = int_to_ptr.vmem [resolvable:$true] %s168_s30 }
   0xa   :  { %v33_v16 = vld [vmem:[#allocation2] sm:$0xff]  ;;  %v34_v20 = vld [vmem:[#allocation2 + $0x8] sm:$0xff]  ;;  %v35_v22 = vld [vmem:[#allocation2 + $0x10] sm:$0xff]  ;;  %s170_s6 = sshll.u32 %s459_s3, 4  ;;  %s171_s6 = int_to_ptr.hbm [resolvable:$true] %s170_s6 }
   0xb   :  { %v320_v7 = vadd.s32 128, %v317_v6  ;;  %v323_v8 = vadd.s32 256, %v317_v6  ;;  %v326_v9 = vadd.s32 384, %v317_v6  ;;  %v36_v23 = vld [vmem:[#allocation2 + $0x18] sm:$0xff]  ;;  %v45_v27 = vld [vmem:[#allocation2 + $0x60] sm:$0xff]  ;;  %v46_v28 = vld [vmem:[#allocation2 + $0x68] sm:$0xff] }
   0xc   :  { %v47_v29 = vld [vmem:[#allocation2 + $0x70] sm:$0xff]  ;;  %v48_v32 = vld [vmem:[#allocation2 + $0x78] sm:$0xff]  ;;  %v37_v34 = vld [vmem:[#allocation2 + $0x20] sm:$0xff] }
   0xd   :  { %v38_v39 = vld [vmem:[#allocation2 + $0x28] sm:$0xff]  ;;  %v39_v42 = vld [vmem:[#allocation2 + $0x30] sm:$0xff]  ;;  %v40_v44 = vld [vmem:[#allocation2 + $0x38] sm:$0xff] }
  0x11   :  { %68 = vperm.xlu1 %192, %v52_v3   ;;  %62 = vperm.xlu0 %191, %v50_v4  }
  0x7b   :  { %v66_v13 = vpop.permute.xlu1 %65  ;;  %v328_v14 = vpop.permute.xlu0 %59 }
  0x7c   :  { %vm78_vm0 = vcmp.lt.s32.totalorder %v317_v6, %v66_v13  ;;  %vm79_vm1 = vcmp.lt.s32.totalorder %v320_v7, %v66_v13  ;;  %vm80_vm2 = vcmp.lt.s32.totalorder %v323_v8, %v66_v13  ;;  %vm81_vm3 = vcmp.lt.s32.totalorder %v326_v9, %v66_v13 }
  0x7d   :  { %v94_v17 = vsel %vm78_vm0, %v41_v10, 0  ;;  %v95_v18 = vsel %vm79_vm1, %v42_v11, 0  ;;  %v96_v19 = vsel %vm80_vm2, %v43_v12, 0  ;;  %v97_v21 = vsel %vm81_vm3, %v44_v15, 0 }
  0x7e   :  { %110 = vst [vmem:[#allocation5 + $0x40] sm:$0xff] %v94_v17  ;;  %vm70_vm4 = vcmp.lt.s32.totalorder %v317_v6, %v328_v14  ;;  %vm71_vm5 = vcmp.lt.s32.totalorder %v320_v7, %v328_v14  ;;  %vm72_vm6 = vcmp.lt.s32.totalorder %v323_v8, %v328_v14  ;;  %vm73_vm7 = vcmp.lt.s32.totalorder %v326_v9, %v328_v14 }
  0x7f   :  { %111 = vst [vmem:[#allocation5 + $0x48] sm:$0xff] %v95_v18  ;;  %v86_v24 = vsel %vm70_vm4, %v33_v16, 0  ;;  %v87_v25 = vsel %vm71_vm5, %v34_v20, 0  ;;  %v88_v26 = vsel %vm72_vm6, %v35_v22, 0  ;;  %v89_v30 = vsel %vm73_vm7, %v36_v23, 0 }
  0x80   :  { %112 = vst [vmem:[#allocation5 + $0x50] sm:$0xff] %v96_v19 }
  0x81   :  { %113 = vst [vmem:[#allocation5 + $0x58] sm:$0xff] %v97_v21 }
  0x82   :  { %102 = vst [vmem:[#allocation5] sm:$0xff] %v86_v24 }
  0x83   :  { %v69_v31 = vpop.permute.xlu1 %68  ;;  %v63_v33 = vpop.permute.xlu0 %62  ;;  %103 = vst [vmem:[#allocation5 + $0x8] sm:$0xff] %v87_v25 }
  0x84   :  { %vm82_vm8 = vcmp.lt.s32.totalorder %v317_v6, %v69_v31  ;;  %vm83_vm9 = vcmp.lt.s32.totalorder %v320_v7, %v69_v31  ;;  %vm84_vm10 = vcmp.lt.s32.totalorder %v323_v8, %v69_v31  ;;  %vm85_vm11 = vcmp.lt.s32.totalorder %v326_v9, %v69_v31  ;;  %104 = vst [vmem:[#allocation5 + $0x10] sm:$0xff] %v88_v26 }
  0x85   :  { %v98_v35 = vsel %vm82_vm8, %v45_v27, 0  ;;  %v99_v36 = vsel %vm83_vm9, %v46_v28, 0  ;;  %v100_v37 = vsel %vm84_vm10, %v47_v29, 0  ;;  %vm370_vm12 = vmpackc.low %vm82_vm8, %vm78_vm0  ;;  %105 = vst [vmem:[#allocation5 + $0x18] sm:$0xff] %v89_v30  ;;  %v101_v40 = vsel %vm85_vm11, %v48_v32, 0 }
  0x86   :  { %114 = vst [vmem:[#allocation5 + $0x60] sm:$0xff] %v98_v35  ;;  %vm378_vm13 = vmpackc.low %vm83_vm9, %vm79_vm1  ;;  %vm74_vm14 = vcmp.lt.s32.totalorder %v317_v6, %v63_v33  ;;  %vm75_vm15 = vcmp.lt.s32.totalorder %v320_v7, %v63_v33  ;;  %vm76_vm0 = vcmp.lt.s32.totalorder %v323_v8, %v63_v33  ;;  %vm77_vm1 = vcmp.lt.s32.totalorder %v326_v9, %v63_v33 }
  0x87   :  { %115 = vst [vmem:[#allocation5 + $0x68] sm:$0xff] %v99_v36  ;;  %vm389_vm8 = vmpackc.low %vm84_vm10, %vm80_vm2  ;;  %v90_v45 = vsel %vm74_vm14, %v37_v34, 0  ;;  %v121_v46 = vsel %vm370_vm12, 16711935, %v274_v0  ;;  %v91_v47 = vsel %vm75_vm15, %v38_v39, 0  ;;  %v92_v49 = vsel %vm76_vm0, %v39_v42, 0 }
  0x88   :  { %116 = vst [vmem:[#allocation5 + $0x70] sm:$0xff] %v100_v37  ;;  %vm137_vm9 = vmpackc.low %vm85_vm11, %vm81_vm3  ;;  %v127_v48 = vsel %vm378_vm13, 16711935, %v274_v0  ;;  %v133_v50 = vsel %vm389_vm8, 16711935, %v274_v0  ;;  %v93_v51 = vsel %vm77_vm1, %v40_v44, 0 }
  0x89   :  { %117 = vst [vmem:[#allocation5 + $0x78] sm:$0xff] %v101_v40  ;;  %vm118_vm2 = vmpackc.low %vm74_vm14, %vm70_vm4  ;;  %v139_v53 = vsel %vm137_vm9, 16711935, %v274_v0 }
  0x8a   :  { %106 = vst [vmem:[#allocation5 + $0x20] sm:$0xff] %v90_v45  ;;  %v120_v52 = vsel %vm118_vm2, 16711935, %v274_v0  ;;  %vm124_vm3 = vmpackc.low %vm75_vm15, %vm71_vm5 }
  0x8b   :  { %107 = vst [vmem:[#allocation5 + $0x28] sm:$0xff] %v91_v47  ;;  %v122_v54 = vpack.c.b8 %v121_v46, %v120_v52  ;;  %v126_v55 = vsel %vm124_vm3, 16711935, %v274_v0  ;;  %vm130_vm4 = vmpackc.low %vm76_vm0, %vm72_vm6 }
  0x8c   :  { %108 = vst [vmem:[#allocation5 + $0x30] sm:$0xff] %v92_v49  ;;  %v128_v56 = vpack.c.b8 %v127_v48, %v126_v55  ;;  %v132_v57 = vsel %vm130_vm4, 16711935, %v274_v0  ;;  %vm136_vm5 = vmpackc.low %vm77_vm1, %vm73_vm7 }
  0x8d   :  { %109 = vst [vmem:[#allocation5 + $0x38] sm:$0xff] %v93_v51  ;;  %vm123_vm10 = vnez %v122_v54  ;;  %v134_v58 = vpack.c.b8 %v133_v50, %v132_v57  ;;  %v138_v59 = vsel %vm136_vm5, 16711935, %v274_v0 }
  0x8e   :  { %vm129_vm6 = vnez %v128_v56  ;;  %v140_v60 = vpack.c.b8 %v139_v53, %v138_v59  ;;  %v142_v61 = vsel %vm123_vm10, 16843009, %v274_v0  ;;  %162 = dma.vmem_to_hbm [thread:$0]  %s155_s26, 2048, %s157_s29, [#allocation4], %s272_s17, %s272_s17, %s273_s18  }
  0x8f   :  { %vm135_vm7 = vnez %v134_v58  ;;  %v143_v62 = vsel %vm129_vm6, 16843009, %v274_v0  ;;  %146 = vst [vmem:[#allocation6] sm:$0xff] %v142_v61 }
  0x90   :  { %vm141_vm11 = vnez %v140_v60  ;;  %v144_v63 = vsel %vm135_vm7, 16843009, %v274_v0  ;;  %147 = vst [vmem:[#allocation6 + $0x8] sm:$0xff] %v143_v62 }
  0x91   :  { %v145_v1 = vsel %vm141_vm11, 16843009, %v274_v0  ;;  %148 = vst [vmem:[#allocation6 + $0x10] sm:$0xff] %v144_v63 }
  0x92   :  { %149 = vst [vmem:[#allocation6 + $0x18] sm:$0xff] %v145_v1 }
  0x93   :  { %173 = dma.vmem_to_hbm [thread:$0]  %s169_s30, 512, %s171_s6, [#allocation7]  }
  0x94   :  { %267 = dma.done.wait [#allocation4], 2048  }
  0x95   :  { %268 = vsyncadd [#allocation4], 4294965248 }
  0x96   :  { %269 = dma.done.wait [#allocation7], 512  }
  0x97   :  { %270 = vsyncadd [#allocation7], 4294966784 }
  0x98   :  { %182 = vsyncpa [#allocation3], 1 }
  0x99   :  { %183 = vsyncpa [#allocation4], 1 }
  0x9a   :  { %184 = vsyncpa [#allocation7], 1 }

</bundles_post_ra>
